<compile_context>
chip_gen: v5e
topology: v5e:2x2
jax: 0.10.0
libtpu: 0.0.40
codegen_flags: <defaults>
</compile_context>

<pallas_src>
import functools

import jax
import jax.numpy as jnp
from jax.experimental import pallas as pl
from jax.experimental.pallas import tpu as pltpu


def _q_mlp_kernel(obs_ref, act_ref, w1o_ref, w1a_ref, b1_ref,
                  w2_ref, b2_ref, w3r_ref, b3_ref, out_ref):
    """Fused MLP: (tb, obs)+(tb, act) -> H1 -> H2 -> (1, tb) lane-dense row."""
    # Layer 1: fused "concat" = two matmuls into the same accumulator + ReLU.
    h1 = jnp.dot(obs_ref[...], w1o_ref[...],
                 preferred_element_type=jnp.float32)
    h1 = h1 + jnp.dot(act_ref[...], w1a_ref[...],
                      preferred_element_type=jnp.float32)
    h1 = jnp.maximum(h1 + b1_ref[...], 0.0)                      # (tb, H1)

    # Layer 2: linear + ReLU.
    h2 = jnp.dot(h1, w2_ref[...], preferred_element_type=jnp.float32)
    h2 = jnp.maximum(h2 + b2_ref[...], 0.0)                      # (tb, H2)

    # Output layer: contract H2 with the rhs transposed so the result is a
    # lane-dense (1, tb) row (unmasked vector stores) instead of a (tb, 1)
    # column (masked 1-lane stores).
    q = jax.lax.dot_general(
        w3r_ref[...], h2,
        dimension_numbers=(((1,), (1,)), ((), ())),
        preferred_element_type=jnp.float32)                      # (1, tb)
    q = q + b3_ref[0]                                            # SMEM scalar bias
    out_ref[...] = q.astype(out_ref.dtype)


def _round_up(x, m):
    return (x + m - 1) // m * m


@functools.partial(jax.jit, static_argnames=("batch_tile",))
def q_mlp_forward(observation, action, params, batch_tile=1024):
    """Q(obs, action) -> q_value of shape (B,)."""
    assert observation.ndim == 2 and action.ndim == 2
    B, obs_dim = observation.shape
    Ba, act_dim = action.shape
    assert Ba == B

    w1, b1, w2, b2, w3, b3 = (params["w1"], params["b1"], params["w2"],
                              params["b2"], params["w3"], params["b3"])
    H1 = w1.shape[1]
    H2 = w2.shape[1]

    # Split W1 so the obs/act concat fuses into the first matmul (tiny slices
    # of a few-KB weight array; done once per call at the XLA level).
    w1o = w1[:obs_dim, :]                                        # (obs_dim, H1)
    w1a = w1[obs_dim:, :]                                        # (act_dim, H1)
    w3r = jnp.transpose(w3)                                      # (1, H2) row
    b3s = jnp.reshape(b3, (1,))                                  # SMEM scalar

    # Batch tiling: big tiles to amortize the ~0.35us per-grid-step overhead.
    # Single tile for small batches; otherwise a lane-dense multiple of 128 so
    # the (1, tb) output block is an exact vreg-lane multiple.
    tb = int(batch_tile)
    if B <= tb:
        tb = _round_up(max(B, 1), 8)
    else:
        tb = _round_up(tb, 128)
    B_pad = _round_up(B, tb)
    if B_pad != B:
        pad = B_pad - B
        observation = jnp.pad(observation, ((0, pad), (0, 0)))
        action = jnp.pad(action, ((0, pad), (0, 0)))

    grid = (B_pad // tb,)

    q_row = pl.pallas_call(
        _q_mlp_kernel,
        out_shape=jax.ShapeDtypeStruct((1, B_pad), jnp.float32),
        grid_spec=pltpu.PrefetchScalarGridSpec(
            num_scalar_prefetch=0,
            grid=grid,
            in_specs=[
                pl.BlockSpec((tb, obs_dim), lambda i: (i, 0)),   # obs tile
                pl.BlockSpec((tb, act_dim), lambda i: (i, 0)),   # act tile
                pl.BlockSpec((obs_dim, H1), lambda i: (0, 0)),   # W1[:obs]  (resident)
                pl.BlockSpec((act_dim, H1), lambda i: (0, 0)),   # W1[obs:]  (resident)
                pl.BlockSpec((1, H1), lambda i: (0, 0)),         # b1        (resident)
                pl.BlockSpec((H1, H2), lambda i: (0, 0)),        # W2        (resident)
                pl.BlockSpec((1, H2), lambda i: (0, 0)),         # b2        (resident)
                pl.BlockSpec((1, H2), lambda i: (0, 0)),         # W3^T row  (resident)
                pl.BlockSpec(memory_space=pltpu.MemorySpace.SMEM),  # b3 scalar
            ],
            out_specs=pl.BlockSpec((1, tb), lambda i: (0, i)),   # lane-dense row
        ),
        compiler_params=pltpu.CompilerParams(
            dimension_semantics=("parallel",)),
    )(observation, action, w1o, w1a, b1, w2, b2, w3r, b3s)

    # .squeeze(-1) as in the PyTorch module (QModelOutputs.q_value); drop any
    # batch padding introduced above.
    return q_row[0, :B]


def init_params(key, in_dim, hidden_sizes):
    """Deterministic init mirroring nn.Linear default (uniform +/- 1/sqrt(fan_in)).

    Weights are stored as (in_features, out_features)."""
    sizes = [in_dim] + list(hidden_sizes) + [1]
    params = {}
    names = ["1", "2", "3"]
    for idx, (fan_in, fan_out) in enumerate(zip(sizes[:-1], sizes[1:])):
        key, kw, kb = jax.random.split(key, 3)
        bound = 1.0 / jnp.sqrt(jnp.float32(fan_in))
        params["w" + names[idx]] = jax.random.uniform(
            kw, (fan_in, fan_out), jnp.float32, -bound, bound)
        params["b" + names[idx]] = jax.random.uniform(
            kb, (1, fan_out), jnp.float32, -bound, bound)
    return params


def reference_forward(observation, action, params):
    """Plain-JAX reference of the same forward pass for sanity checking."""
    x = jnp.concatenate([observation, action], axis=1)
    h1 = jnp.maximum(x @ params["w1"] + params["b1"], 0.0)
    h2 = jnp.maximum(h1 @ params["w2"] + params["b2"], 0.0)
    q = h2 @ params["w3"] + params["b3"]
    return q[:, 0]


if __name__ == "__main__":
    # Small shapes consistent with the module: 1-D Box obs/action spaces.
    obs_dim = 16
    act_dim = 8
    hidden_sizes = (32, 32)

    key = jax.random.PRNGKey(0)
    k_obs, k_act, k_par = jax.random.split(key, 3)
    params = init_params(k_par, obs_dim + act_dim, hidden_sizes)

    # Check 1: tiny batch (single tile, tb == B rounded to sublane multiple).
    batch = 8
    observation = jax.random.normal(k_obs, (batch, obs_dim), jnp.float32)
    action = jax.random.normal(k_act, (batch, act_dim), jnp.float32)
    q = jax.block_until_ready(q_mlp_forward(observation, action, params))
    q_ref = reference_forward(observation, action, params)
    assert q.shape == (batch,)
    assert jnp.allclose(q, q_ref, atol=1e-5, rtol=1e-5)

    # Check 2: ragged batch with a multi-step grid (exercises padding, the
    # lane-dense tiled output path, and megacore-shardable grid).
    batch2 = 300
    k_obs2, k_act2 = jax.random.split(jax.random.PRNGKey(1))
    observation2 = jax.random.normal(k_obs2, (batch2, obs_dim), jnp.float32)
    action2 = jax.random.normal(k_act2, (batch2, act_dim), jnp.float32)
    q2 = jax.block_until_ready(
        q_mlp_forward(observation2, action2, params, batch_tile=128))
    q2_ref = reference_forward(observation2, action2, params)
    assert q2.shape == (batch2,)
    assert jnp.allclose(q2, q2_ref, atol=1e-5, rtol=1e-5)

    print("KERNEL_OK")
</pallas_src>

<mosaic_0001>
module attributes {stable_mosaic.version = 11 : i64} {
  func.func @_q_mlp_kernel(%arg0: i32, %arg1: memref<8x16xf32, #tpu.memory_space<vmem>>, %arg2: memref<8x8xf32, #tpu.memory_space<vmem>>, %arg3: memref<16x32xf32, #tpu.memory_space<vmem>>, %arg4: memref<8x32xf32, #tpu.memory_space<vmem>>, %arg5: memref<1x32xf32, #tpu.memory_space<vmem>>, %arg6: memref<32x32xf32, #tpu.memory_space<vmem>>, %arg7: memref<1x32xf32, #tpu.memory_space<vmem>>, %arg8: memref<1x32xf32, #tpu.memory_space<vmem>>, %arg9: memref<1xf32, #tpu.memory_space<smem>>, %arg10: memref<1x8xf32, #tpu.memory_space<vmem>>) attributes {dimension_semantics = [#tpu.dimension_semantics<parallel>], iteration_bounds = array<i64: 1>, scalar_prefetch = 0 : i64, scratch_operands = 0 : i64, tpu.core_type = #tpu.core_type<tc>, window_params = [{transform_indices = @transform_0, window_bounds = array<i64: 8, 16>}, {transform_indices = @transform_1, window_bounds = array<i64: 8, 8>}, {pipeline_mode = #tpu.pipeline_mode<synchronous>, transform_indices = @transform_2, window_bounds = array<i64: 16, 32>}, {pipeline_mode = #tpu.pipeline_mode<synchronous>, transform_indices = @transform_3, window_bounds = array<i64: 8, 32>}, {pipeline_mode = #tpu.pipeline_mode<synchronous>, transform_indices = @transform_4, window_bounds = array<i64: 1, 32>}, {pipeline_mode = #tpu.pipeline_mode<synchronous>, transform_indices = @transform_5, window_bounds = array<i64: 32, 32>}, {pipeline_mode = #tpu.pipeline_mode<synchronous>, transform_indices = @transform_6, window_bounds = array<i64: 1, 32>}, {pipeline_mode = #tpu.pipeline_mode<synchronous>, transform_indices = @transform_7, window_bounds = array<i64: 1, 32>}, {transform_indices = @transform_8, window_bounds = array<i64: 1>}, {transform_indices = @transform_9, window_bounds = array<i64: 1, 8>}]} {
    %c0 = arith.constant 0 : index
    %c0_0 = arith.constant 0 : index
    %0 = vector.load %arg1[%c0, %c0_0] : memref<8x16xf32, #tpu.memory_space<vmem>>, vector<8x16xf32>
    %c0_1 = arith.constant 0 : index
    %c0_2 = arith.constant 0 : index
    %1 = vector.load %arg3[%c0_1, %c0_2] : memref<16x32xf32, #tpu.memory_space<vmem>>, vector<16x32xf32>
    %cst = arith.constant dense<0.000000e+00> : vector<8x32xf32>
    %2 = tpu.matmul %0, %1, %cst {dimension_numbers = #tpu.dot_dimension_numbers<[1], [0], [0], [1], [0, 0, 1, 1], [], []>} : vector<8x16xf32>, vector<16x32xf32>, vector<8x32xf32> -> vector<8x32xf32>
    %c0_3 = arith.constant 0 : index
    %c0_4 = arith.constant 0 : index
    %3 = vector.load %arg2[%c0_3, %c0_4] : memref<8x8xf32, #tpu.memory_space<vmem>>, vector<8x8xf32>
    %c0_5 = arith.constant 0 : index
    %c0_6 = arith.constant 0 : index
    %4 = vector.load %arg4[%c0_5, %c0_6] : memref<8x32xf32, #tpu.memory_space<vmem>>, vector<8x32xf32>
    %cst_7 = arith.constant dense<0.000000e+00> : vector<8x32xf32>
    %5 = tpu.matmul %3, %4, %cst_7 {dimension_numbers = #tpu.dot_dimension_numbers<[1], [0], [0], [1], [0, 0, 1, 1], [], []>} : vector<8x8xf32>, vector<8x32xf32>, vector<8x32xf32> -> vector<8x32xf32>
    %6 = arith.addf %2, %5 : vector<8x32xf32>
    %c0_8 = arith.constant 0 : index
    %c0_9 = arith.constant 0 : index
    %7 = vector.load %arg5[%c0_8, %c0_9] : memref<1x32xf32, #tpu.memory_space<vmem>>, vector<1x32xf32>
    %8 = vector.broadcast %7 : vector<1x32xf32> to vector<8x32xf32>
    %9 = arith.addf %6, %8 : vector<8x32xf32>
    %cst_10 = arith.constant 0.000000e+00 : f32
    %10 = vector.broadcast %cst_10 : f32 to vector<8x32xf32>
    %11 = arith.maximumf %9, %10 : vector<8x32xf32>
    %c0_11 = arith.constant 0 : index
    %c0_12 = arith.constant 0 : index
    %12 = vector.load %arg6[%c0_11, %c0_12] : memref<32x32xf32, #tpu.memory_space<vmem>>, vector<32x32xf32>
    %cst_13 = arith.constant dense<0.000000e+00> : vector<8x32xf32>
    %13 = tpu.matmul %11, %12, %cst_13 {dimension_numbers = #tpu.dot_dimension_numbers<[1], [0], [0], [1], [0, 0, 1, 1], [], []>} : vector<8x32xf32>, vector<32x32xf32>, vector<8x32xf32> -> vector<8x32xf32>
    %c0_14 = arith.constant 0 : index
    %c0_15 = arith.constant 0 : index
    %14 = vector.load %arg7[%c0_14, %c0_15] : memref<1x32xf32, #tpu.memory_space<vmem>>, vector<1x32xf32>
    %15 = vector.broadcast %14 : vector<1x32xf32> to vector<8x32xf32>
    %16 = arith.addf %13, %15 : vector<8x32xf32>
    %cst_16 = arith.constant 0.000000e+00 : f32
    %17 = vector.broadcast %cst_16 : f32 to vector<8x32xf32>
    %18 = arith.maximumf %16, %17 : vector<8x32xf32>
    %c0_17 = arith.constant 0 : index
    %c0_18 = arith.constant 0 : index
    %19 = vector.load %arg8[%c0_17, %c0_18] : memref<1x32xf32, #tpu.memory_space<vmem>>, vector<1x32xf32>
    %cst_19 = arith.constant dense<0.000000e+00> : vector<1x8xf32>
    %20 = tpu.matmul %19, %18, %cst_19 {dimension_numbers = #tpu.dot_dimension_numbers<[1], [1], [0], [0], [0, 0, 1, 0], [], []>} : vector<1x32xf32>, vector<8x32xf32>, vector<1x8xf32> -> vector<1x8xf32>
    %c0_20 = arith.constant 0 : index
    %21 = memref.load %arg9[%c0_20] : memref<1xf32, #tpu.memory_space<smem>>
    %22 = vector.broadcast %21 : f32 to vector<1x8xf32>
    %23 = arith.addf %20, %22 : vector<1x8xf32>
    %c0_21 = arith.constant 0 : index
    %c0_22 = arith.constant 0 : index
    %24 = vector.load %arg10[%c0_21, %c0_22] : memref<1x8xf32, #tpu.memory_space<vmem>>, vector<1x8xf32>
    tpu.vector_store %arg10[%c0_21, %c0_22], %23 {strides = array<i32>} : memref<1x8xf32, #tpu.memory_space<vmem>>, vector<1x8xf32>,
    return
  }
  func.func @transform_0(%arg0: i32) -> (i32, i32) {
    %c0_i32 = arith.constant 0 : i32
    %c0_i32_0 = arith.constant 0 : i32
    return %arg0, %c0_i32 : i32, i32
  }
  func.func @transform_1(%arg0: i32) -> (i32, i32) {
    %c0_i32 = arith.constant 0 : i32
    %c0_i32_0 = arith.constant 0 : i32
    return %arg0, %c0_i32 : i32, i32
  }
  func.func @transform_2(%arg0: i32) -> (i32, i32) {
    %c0_i32 = arith.constant 0 : i32
    %c0_i32_0 = arith.constant 0 : i32
    %c0_i32_1 = arith.constant 0 : i32
    return %c0_i32, %c0_i32_0 : i32, i32
  }
  func.func @transform_3(%arg0: i32) -> (i32, i32) {
    %c0_i32 = arith.constant 0 : i32
    %c0_i32_0 = arith.constant 0 : i32
    %c0_i32_1 = arith.constant 0 : i32
    return %c0_i32, %c0_i32_0 : i32, i32
  }
  func.func @transform_4(%arg0: i32) -> (i32, i32) {
    %c0_i32 = arith.constant 0 : i32
    %c0_i32_0 = arith.constant 0 : i32
    %c0_i32_1 = arith.constant 0 : i32
    return %c0_i32, %c0_i32_0 : i32, i32
  }
  func.func @transform_5(%arg0: i32) -> (i32, i32) {
    %c0_i32 = arith.constant 0 : i32
    %c0_i32_0 = arith.constant 0 : i32
    %c0_i32_1 = arith.constant 0 : i32
    return %c0_i32, %c0_i32_0 : i32, i32
  }
  func.func @transform_6(%arg0: i32) -> (i32, i32) {
    %c0_i32 = arith.constant 0 : i32
    %c0_i32_0 = arith.constant 0 : i32
    %c0_i32_1 = arith.constant 0 : i32
    return %c0_i32, %c0_i32_0 : i32, i32
  }
  func.func @transform_7(%arg0: i32) -> (i32, i32) {
    %c0_i32 = arith.constant 0 : i32
    %c0_i32_0 = arith.constant 0 : i32
    %c0_i32_1 = arith.constant 0 : i32
    return %c0_i32, %c0_i32_0 : i32, i32
  }
  func.func @transform_8(%arg0: i32) -> i32 {
    %c0_i32 = arith.constant 0 : i32
    %c0_i32_0 = arith.constant 0 : i32
    return %c0_i32 : i32
  }
  func.func @transform_9(%arg0: i32) -> (i32, i32) {
    %c0_i32 = arith.constant 0 : i32
    %c0_i32_0 = arith.constant 0 : i32
    return %c0_i32, %arg0 : i32, i32
  }
}

</mosaic_0001>

<bundles_post_ra>
// kernel: q_mlp_forward.1
= control target key start
LH: loop header
LB: loop body
LE: loop exit
PB: predicated region body
PF: predicated region fallthrough
CT: control target
= control target key end

     0   :  { %15 = vsyncpa [#allocation4], 0  ;;  %s340_s0 = inlined_call_operand.vmem [shape: f32[8,16], index: 0, kind: input, shape index: {}]   ;;  %s341_s1 = inlined_call_operand.vmem [shape: f32[8,8], index: 1, kind: input, shape index: {}]   ;;  %s342_s2 = inlined_call_operand.vmem [shape: f32[16,32], index: 2, kind: input, shape index: {}]   ;;  %s343_s3 = inlined_call_operand.vmem [shape: f32[8,32], index: 3, kind: input, shape index: {}]   ;;  %s344_s4 = inlined_call_operand.vmem [shape: f32[1,32], index: 4, kind: input, shape index: {}]   ;;  %s345_s5 = inlined_call_operand.hbm [shape: f32[32,32], index: 5, kind: input, shape index: {}]   ;;  %s346_s6 = inlined_call_operand.vmem [shape: f32[1,32], index: 6, kind: input, shape index: {}]   ;;  %s347_s7 = inlined_call_operand.vmem [shape: f32[1,32], index: 7, kind: input, shape index: {}]   ;;  %s348_s8 = inlined_call_operand.<no memory space> [shape: f32[1], index: 8, kind: input, shape index: {}]   ;;  %s349_s9 = inlined_call_operand.hbm [shape: f32[1,8], index: 9, kind: output, shape index: {}]  }
   0x1   :  { %16 = vsyncpa [#allocation5], 0  ;;  %s31_s11 = sshll.u32 %s345_s5, 4  ;;  %s253_s12 = smov [#allocation3]   ;;  %s32_s11 = int_to_ptr.hbm [resolvable:$true] %s31_s11 }
   0x2   :  { %s33_s13 = sshll.u32 %s253_s12, 4  ;;  %s254_s14 = smov 128   ;;  %s34_s13 = int_to_ptr.vmem [resolvable:$true] %s33_s13 }
   0x3   :  { %s255_s15 = smov 8  }
   0x4   :  { %39 = dma.hbm_to_vmem [thread:$0]  %s32_s11, 512, %s34_s13, [#allocation4], %s254_s14, %s254_s14, %s255_s15  }
   0x5   :  { %249 = dma.done.wait [#allocation4], 512  }
   0x6   :  { %250 = vsyncadd [#allocation4], 4294966784  ;;  %vm55_vm0 = vcmask 64512   ;;  %v52_v0 = vld [vmem:[%s342_s2 + $0x8] sm:$0xff]  ;;  %v54_v1 = vld [vmem:[%s343_s3] sm:$0xff]  ;;  %vm79_vm1 = vcmask 130048   ;;  %v144_v20 = vstv %s348_s8 }
   0x7   :  { %v51_v2 = vld [vmem:[%s342_s2] sm:$0xff]  ;;  %97 = vmatpush.msra.mxu1 %v52_v0  ;;  %74 = vmatpush.msra.mxu0 %v54_v1  ;;  %v112_v5 = vld [vmem:[#allocation3 + $0x18] sm:$0xff]  ;;  %v111_v6 = vld [vmem:[#allocation3 + $0x10] sm:$0xff]  ;;  %vm117_vm2 = vcmask 261120   ;;  %s256_s28 = smov [#allocation6]   ;;  %s180_s11 = sshll.u32 %s349_s9, 4  ;;  %s181_s11 = int_to_ptr.hbm [resolvable:$true] %s180_s11 }
   0x8   :  { %v53_v3 = vld [vmem:[%s341_s1] sm:$0xff]  ;;  %133 = vmatpush.msra.mxu2 %v112_v5  ;;  %v110_v7 = vld [vmem:[#allocation3 + $0x8] sm:$0xff]  ;;  %s178_s29 = sshll.u32 %s256_s28, 4  ;;  %vm171_vm3 = vcmask 57344   ;;  %s179_s29 = int_to_ptr.vmem [resolvable:$true] %s178_s29 }
   0x9   :  { %v50_v4 = vld [vmem:[%s340_s0] sm:$0xff]  ;;  %190 = vmatmul.msk.f32.vlgmr.msra.gmra.mxu0 %vm55_vm0, %v53_v3  ;;  %98 = vmatpush.msra.mxu1 %v51_v2 }
   0xa   :  { %191 = vmatmul.msk.f32.vlgmr.msra.gmra.mxu1 %vm79_vm1, %v50_v4  ;;  %134 = vmatpush.msra.mxu2 %v111_v6  ;;  %v109_v8 = vld [vmem:[#allocation3] sm:$0xff] }
   0xb   :  { %v199_v10 = vld [vmem:[%s344_s4] ss:$0 sm:$0xff] }
   0xc   :  { %135 = vmatpush.msra.mxu2 %v110_v7  ;;  %v200_v15 = vld [vmem:[%s346_s6] ss:$0 sm:$0xff] }
   0xd   :  { %v142_v19 = vld [vmem:[%s347_s7] sm:$0x1] }
   0xe   :  { %136 = vmatpush.msra.mxu2 %v109_v8 }
  0x86   :  { %v76_v9 = vpop.f32.mrf.mxu0 }
  0x87   :  { %v100_v11 = vpop.f32.mrf.mxu1 }
  0x88   :  { %v101_v12 = vadd.f32 %v100_v11, %v76_v9 }
  0x8a   :  { %v107_v13 = vadd.f32 %v199_v10, %v101_v12 }
  0x8c   :  { %v108_v14 = vmax.f32 %v107_v13, 0.0 }
  0x8e   :  { %192 = vmatmul.msk.f32.vlgmr.msra.gmra.mxu2 %vm117_vm2, %v108_v14 }
 0x111   :  { %v138_v16 = vpop.f32.mrf.mxu2 }
 0x112   :  { %v139_v17 = vadd.f32 %v200_v15, %v138_v16 }
 0x114   :  { %v141_v18 = vmax.f32 %v139_v17, 0.0 }
 0x116   :  { %193 = vmatpush.xpose.msk.msra.mxu3 %vm117_vm2, %v141_v18 }
 0x119   :  { %194 = vmatmul.msk.f32.vlgmr.msra.gmra.mxu3 %vm117_vm2, %v142_v19 }
 0x19c   :  { %v168_v21 = vpop.f32.mrf.mxu3 }
 0x19d   :  { %v169_v22 = vadd.f32 %v168_v21, %v144_v20 }
 0x19f   :  { %172 = vst.msk [vmem:[#allocation6] sm:$0x1] %vm171_vm3, %v169_v22 }
 0x1a0   :  { %183 = dma.vmem_to_hbm [thread:$0]  %s179_s29, 16, %s181_s11, [#allocation5]  }
 0x1a1   :  { %251 = dma.done.wait [#allocation5], 16  }
 0x1a2   :  { %252 = vsyncadd [#allocation5], 4294967280 }
 0x1a3   :  { %188 = vsyncpa [#allocation4], 1 }
 0x1a4   :  { %189 = vsyncpa [#allocation5], 1 }

</bundles_post_ra>
